<compile_context>
chip_gen: v5e
topology: v5e:2x2
jax: 0.10.0
libtpu: 0.0.40
codegen_flags: <defaults>
</compile_context>

<pallas_src>
import jax
import jax.numpy as jnp
from jax.experimental import pallas as pl
from jax.experimental.pallas import tpu as pltpu

_PREC = jax.lax.Precision.HIGHEST  # f32-accurate MXU contraction
_VMEM_BUDGET = 40 * 2**20          # conservative vs v7x's 64 MiB physical VMEM


def _round_up(x: int, m: int) -> int:
    return ((x + m - 1) // m) * m


def _pad2d(a, rows, cols):
    return jnp.pad(a, ((0, rows - a.shape[0]), (0, cols - a.shape[1])))


def _choose_tm(n: int, tm_max: int = 1024, tm_min: int = 256) -> int:
    """Large tiles to amortize per-step overhead; >=2 steps when possible (v7x)."""
    n8 = _round_up(max(n, 1), 8)
    if n8 <= tm_min:
        return n8                       # tiny batch: one small step
    tm = _round_up(-(-n8 // 2), 8)      # aim for at least 2 grid steps
    return max(tm_min, min(tm, tm_max))


def _vmem_estimate(tm: int, d_in: int, hp: int, d_out: int) -> int:
    f32 = 4
    resident = f32 * (d_in * hp + 2 * hp * hp + hp * d_out + 3 * hp + d_out)
    resident *= 2                                   # possible double-buffering of blocks
    per_step = 2 * f32 * tm * (d_in + d_out)        # double-buffered x / out tiles
    live = 2 * f32 * tm * hp                        # in-flight activations
    return resident + per_step + live


def prepare_params(params):
    """One-time: transpose to (in, out), pad hidden dim to a multiple of 128.

    PyTorch F.linear convention: w1 (H, D_in), b1 (H,), w2/w3 (H, H), w4 (D_out, H).
    Zero-padded hidden columns get bias 0 -> ReLU 0, so they contribute nothing.
    """
    H, _ = params["w1"].shape
    D_in = params["w1"].shape[1]
    D_out = params["w4"].shape[0]
    Hp = _round_up(max(H, 1), 128)
    f32 = jnp.float32
    return {
        "w1t": _pad2d(params["w1"].T.astype(f32), D_in, Hp),   # (D_in, Hp)
        "b1": _pad2d(params["b1"].reshape(1, -1).astype(f32), 1, Hp),
        "w2t": _pad2d(params["w2"].T.astype(f32), Hp, Hp),     # (Hp, Hp)
        "b2": _pad2d(params["b2"].reshape(1, -1).astype(f32), 1, Hp),
        "w3t": _pad2d(params["w3"].T.astype(f32), Hp, Hp),     # (Hp, Hp)
        "b3": _pad2d(params["b3"].reshape(1, -1).astype(f32), 1, Hp),
        "w4t": _pad2d(params["w4"].T.astype(f32), Hp, D_out),  # (Hp, D_out) — no D_out pad
        "b4": _pad2d(params["b4"].reshape(1, -1).astype(f32), 1, D_out),
    }


def mlp_kernel(x_ref, w1_ref, b1_ref, w2_ref, b2_ref, w3_ref, b3_ref,
               w4_ref, b4_ref, o_ref):
    # Layer 1 (f32 MXU, f32-accurate contraction), bias + ReLU
    h = jnp.dot(x_ref[...], w1_ref[...],
                preferred_element_type=jnp.float32, precision=_PREC)
    h = jnp.maximum(h + b1_ref[...], 0.0)
    # Layer 2
    h = jnp.dot(h, w2_ref[...], preferred_element_type=jnp.float32, precision=_PREC)
    h = jnp.maximum(h + b2_ref[...], 0.0)
    # Layer 3
    h = jnp.dot(h, w3_ref[...], preferred_element_type=jnp.float32, precision=_PREC)
    h = jnp.maximum(h + b3_ref[...], 0.0)
    # Layer 4 (no ReLU); store only the true D_out columns
    out = jnp.dot(h, w4_ref[...], preferred_element_type=jnp.float32,
                  precision=_PREC) + b4_ref[...]
    o_ref[...] = out.astype(o_ref.dtype)


@jax.jit
def mlp_forward(x, prep):
    """x: (N, D_in) f32. prep: output of prepare_params. Returns (N, D_out) f32."""
    N, D_in = x.shape
    assert prep["w1t"].shape[0] == D_in
    Hp = prep["w1t"].shape[1]
    D_out = prep["w4t"].shape[1]

    tm = _choose_tm(N)
    # VMEM guard: shrink the batch tile first; bail out if resident weights alone
    # exceed the budget (needs a K-tiled fallback for very large H).
    while _vmem_estimate(tm, D_in, Hp, D_out) > _VMEM_BUDGET and tm > 64:
        tm = max(8, _round_up(tm // 2, 8))
    if _vmem_estimate(tm, D_in, Hp, D_out) > _VMEM_BUDGET:
        # TODO(synk): add a K-tiled (hidden-dim tiled) fallback for H large enough
        # that resident weights exceed the v7x VMEM budget.
        raise ValueError("Hidden size too large for all-weights-resident kernel.")

    Np = _round_up(max(N, 1), tm)
    xp = x if Np == N else jnp.pad(x, ((0, Np - N), (0, 0)))  # rows only, when needed

    est = _vmem_estimate(tm, D_in, Hp, D_out)
    vmem_limit = None
    if est > 12 * 2**20:
        vmem_limit = int(min(max(2 * est, 32 * 2**20), 64 * 2**20))

    resident = lambda r, c: pl.BlockSpec((r, c), lambda i: (0, 0))
    in_specs = [
        pl.BlockSpec((tm, D_in), lambda i: (i, 0)),  # x tile (pipelined over batch)
        resident(D_in, Hp),  resident(1, Hp),        # w1t, b1
        resident(Hp, Hp),    resident(1, Hp),        # w2t, b2
        resident(Hp, Hp),    resident(1, Hp),        # w3t, b3
        resident(Hp, D_out), resident(1, D_out),     # w4t, b4
    ]
    out_spec = pl.BlockSpec((tm, D_out), lambda i: (i, 0))

    out = pl.pallas_call(
        mlp_kernel,
        out_shape=jax.ShapeDtypeStruct((Np, D_out), jnp.float32),
        grid=(Np // tm,),
        in_specs=in_specs,
        out_specs=out_spec,
        compiler_params=pltpu.CompilerParams(
            dimension_semantics=("parallel",),
            vmem_limit_bytes=vmem_limit,
        ),
    )(xp, prep["w1t"], prep["b1"], prep["w2t"], prep["b2"],
      prep["w3t"], prep["b3"], prep["w4t"], prep["b4"])

    return out if Np == N else out[:N]


def mlp_reference(x, params):
    """Pure-f32 reference matching the PyTorch module (F.linear + ReLU x3 + F.linear)."""
    def lin(h, w, b):
        return jnp.dot(h, w.T, precision=_PREC) + b
    h = jnp.maximum(lin(x, params["w1"], params["b1"]), 0.0)
    h = jnp.maximum(lin(h, params["w2"], params["b2"]), 0.0)
    h = jnp.maximum(lin(h, params["w3"], params["b3"]), 0.0)
    return lin(h, params["w4"], params["b4"])


if __name__ == "__main__":
    # Small shapes consistent with the module: N x D_in input, hidden H, D_out output.
    N, D_in, H, D_out = 2, 16, 32, 8

    key = jax.random.PRNGKey(0)
    ks = jax.random.split(key, 9)
    params = {
        "w1": jax.random.normal(ks[0], (H, D_in), dtype=jnp.float32),
        "b1": jax.random.normal(ks[1], (H,), dtype=jnp.float32),
        "w2": jax.random.normal(ks[2], (H, H), dtype=jnp.float32),
        "b2": jax.random.normal(ks[3], (H,), dtype=jnp.float32),
        "w3": jax.random.normal(ks[4], (H, H), dtype=jnp.float32),
        "b3": jax.random.normal(ks[5], (H,), dtype=jnp.float32),
        "w4": jax.random.normal(ks[6], (D_out, H), dtype=jnp.float32),
        "b4": jax.random.normal(ks[7], (D_out,), dtype=jnp.float32),
    }
    x = jax.random.uniform(ks[8], (N, D_in), dtype=jnp.float32)

    prep = prepare_params(params)  # one-time weight prep (hoisted out of forward)

    y = jax.block_until_ready(mlp_forward(x, prep))
    assert y.shape == (N, D_out)
    y_ref = mlp_reference(x, params)
    assert jnp.allclose(y, y_ref, atol=5e-2, rtol=5e-3), "mismatch vs f32 reference"

    # Larger batch exercising a multi-step 'parallel' grid (>= 2 steps for v7x megacore).
    x2 = jax.random.uniform(jax.random.PRNGKey(1), (520, D_in), dtype=jnp.float32)
    y2 = jax.block_until_ready(mlp_forward(x2, prep))
    assert y2.shape == (520, D_out)
    assert jnp.allclose(y2, mlp_reference(x2, params), atol=5e-2, rtol=5e-3), \
        "mismatch vs f32 reference (batched/tiled path)"

    print("KERNEL_OK")
</pallas_src>

<mosaic_0001>
module attributes {stable_mosaic.version = 11 : i64} {
  func.func @mlp_kernel(%arg0: i32, %arg1: memref<8x16xf32, #tpu.memory_space<vmem>>, %arg2: memref<16x128xf32, #tpu.memory_space<vmem>>, %arg3: memref<1x128xf32, #tpu.memory_space<vmem>>, %arg4: memref<128x128xf32, #tpu.memory_space<vmem>>, %arg5: memref<1x128xf32, #tpu.memory_space<vmem>>, %arg6: memref<128x128xf32, #tpu.memory_space<vmem>>, %arg7: memref<1x128xf32, #tpu.memory_space<vmem>>, %arg8: memref<128x8xf32, #tpu.memory_space<vmem>>, %arg9: memref<1x8xf32, #tpu.memory_space<vmem>>, %arg10: memref<8x8xf32, #tpu.memory_space<vmem>>) attributes {dimension_semantics = [#tpu.dimension_semantics<parallel>], iteration_bounds = array<i64: 1>, scalar_prefetch = 0 : i64, scratch_operands = 0 : i64, tpu.core_type = #tpu.core_type<tc>, window_params = [{transform_indices = @transform_0, window_bounds = array<i64: 8, 16>}, {pipeline_mode = #tpu.pipeline_mode<synchronous>, transform_indices = @transform_1, window_bounds = array<i64: 16, 128>}, {pipeline_mode = #tpu.pipeline_mode<synchronous>, transform_indices = @transform_2, window_bounds = array<i64: 1, 128>}, {pipeline_mode = #tpu.pipeline_mode<synchronous>, transform_indices = @transform_3, window_bounds = array<i64: 128, 128>}, {pipeline_mode = #tpu.pipeline_mode<synchronous>, transform_indices = @transform_4, window_bounds = array<i64: 1, 128>}, {pipeline_mode = #tpu.pipeline_mode<synchronous>, transform_indices = @transform_5, window_bounds = array<i64: 128, 128>}, {pipeline_mode = #tpu.pipeline_mode<synchronous>, transform_indices = @transform_6, window_bounds = array<i64: 1, 128>}, {pipeline_mode = #tpu.pipeline_mode<synchronous>, transform_indices = @transform_7, window_bounds = array<i64: 128, 8>}, {pipeline_mode = #tpu.pipeline_mode<synchronous>, transform_indices = @transform_8, window_bounds = array<i64: 1, 8>}, {transform_indices = @transform_9, window_bounds = array<i64: 8, 8>}]} {
    %c0 = arith.constant 0 : index
    %c0_0 = arith.constant 0 : index
    %0 = vector.load %arg1[%c0, %c0_0] : memref<8x16xf32, #tpu.memory_space<vmem>>, vector<8x16xf32>
    %c0_1 = arith.constant 0 : index
    %c0_2 = arith.constant 0 : index
    %1 = vector.load %arg2[%c0_1, %c0_2] : memref<16x128xf32, #tpu.memory_space<vmem>>, vector<16x128xf32>
    %cst = arith.constant dense<0.000000e+00> : vector<8x128xf32>
    %2 = tpu.matmul %0, %1, %cst {dimension_numbers = #tpu.dot_dimension_numbers<[1], [0], [0], [1], [0, 0, 1, 1], [], []>, precision = #tpu.contract_precision<fp32>} : vector<8x16xf32>, vector<16x128xf32>, vector<8x128xf32> -> vector<8x128xf32>
    %c0_3 = arith.constant 0 : index
    %c0_4 = arith.constant 0 : index
    %3 = vector.load %arg3[%c0_3, %c0_4] : memref<1x128xf32, #tpu.memory_space<vmem>>, vector<1x128xf32>
    %4 = vector.broadcast %3 : vector<1x128xf32> to vector<8x128xf32>
    %5 = arith.addf %2, %4 : vector<8x128xf32>
    %cst_5 = arith.constant 0.000000e+00 : f32
    %6 = vector.broadcast %cst_5 : f32 to vector<8x128xf32>
    %7 = arith.maximumf %5, %6 : vector<8x128xf32>
    %c0_6 = arith.constant 0 : index
    %c0_7 = arith.constant 0 : index
    %8 = vector.load %arg4[%c0_6, %c0_7] : memref<128x128xf32, #tpu.memory_space<vmem>>, vector<128x128xf32>
    %cst_8 = arith.constant dense<0.000000e+00> : vector<8x128xf32>
    %9 = tpu.matmul %7, %8, %cst_8 {dimension_numbers = #tpu.dot_dimension_numbers<[1], [0], [0], [1], [0, 0, 1, 1], [], []>, precision = #tpu.contract_precision<fp32>} : vector<8x128xf32>, vector<128x128xf32>, vector<8x128xf32> -> vector<8x128xf32>
    %c0_9 = arith.constant 0 : index
    %c0_10 = arith.constant 0 : index
    %10 = vector.load %arg5[%c0_9, %c0_10] : memref<1x128xf32, #tpu.memory_space<vmem>>, vector<1x128xf32>
    %11 = vector.broadcast %10 : vector<1x128xf32> to vector<8x128xf32>
    %12 = arith.addf %9, %11 : vector<8x128xf32>
    %cst_11 = arith.constant 0.000000e+00 : f32
    %13 = vector.broadcast %cst_11 : f32 to vector<8x128xf32>
    %14 = arith.maximumf %12, %13 : vector<8x128xf32>
    %c0_12 = arith.constant 0 : index
    %c0_13 = arith.constant 0 : index
    %15 = vector.load %arg6[%c0_12, %c0_13] : memref<128x128xf32, #tpu.memory_space<vmem>>, vector<128x128xf32>
    %cst_14 = arith.constant dense<0.000000e+00> : vector<8x128xf32>
    %16 = tpu.matmul %14, %15, %cst_14 {dimension_numbers = #tpu.dot_dimension_numbers<[1], [0], [0], [1], [0, 0, 1, 1], [], []>, precision = #tpu.contract_precision<fp32>} : vector<8x128xf32>, vector<128x128xf32>, vector<8x128xf32> -> vector<8x128xf32>
    %c0_15 = arith.constant 0 : index
    %c0_16 = arith.constant 0 : index
    %17 = vector.load %arg7[%c0_15, %c0_16] : memref<1x128xf32, #tpu.memory_space<vmem>>, vector<1x128xf32>
    %18 = vector.broadcast %17 : vector<1x128xf32> to vector<8x128xf32>
    %19 = arith.addf %16, %18 : vector<8x128xf32>
    %cst_17 = arith.constant 0.000000e+00 : f32
    %20 = vector.broadcast %cst_17 : f32 to vector<8x128xf32>
    %21 = arith.maximumf %19, %20 : vector<8x128xf32>
    %c0_18 = arith.constant 0 : index
    %c0_19 = arith.constant 0 : index
    %22 = vector.load %arg8[%c0_18, %c0_19] : memref<128x8xf32, #tpu.memory_space<vmem>>, vector<128x8xf32>
    %cst_20 = arith.constant dense<0.000000e+00> : vector<8x8xf32>
    %23 = tpu.matmul %21, %22, %cst_20 {dimension_numbers = #tpu.dot_dimension_numbers<[1], [0], [0], [1], [0, 0, 1, 1], [], []>, precision = #tpu.contract_precision<fp32>} : vector<8x128xf32>, vector<128x8xf32>, vector<8x8xf32> -> vector<8x8xf32>
    %c0_21 = arith.constant 0 : index
    %c0_22 = arith.constant 0 : index
    %24 = vector.load %arg9[%c0_21, %c0_22] : memref<1x8xf32, #tpu.memory_space<vmem>>, vector<1x8xf32>
    %25 = vector.broadcast %24 : vector<1x8xf32> to vector<8x8xf32>
    %26 = arith.addf %23, %25 : vector<8x8xf32>
    %c0_23 = arith.constant 0 : index
    %c0_24 = arith.constant 0 : index
    %27 = vector.load %arg10[%c0_23, %c0_24] : memref<8x8xf32, #tpu.memory_space<vmem>>, vector<8x8xf32>
    tpu.vector_store %arg10[%c0_23, %c0_24], %26 {strides = array<i32>} : memref<8x8xf32, #tpu.memory_space<vmem>>, vector<8x8xf32>,
    return
  }
  func.func @transform_0(%arg0: i32) -> (i32, i32) {
    %c0_i32 = arith.constant 0 : i32
    %c0_i32_0 = arith.constant 0 : i32
    return %arg0, %c0_i32 : i32, i32
  }
  func.func @transform_1(%arg0: i32) -> (i32, i32) {
    %c0_i32 = arith.constant 0 : i32
    %c0_i32_0 = arith.constant 0 : i32
    %c0_i32_1 = arith.constant 0 : i32
    return %c0_i32, %c0_i32_0 : i32, i32
  }
  func.func @transform_2(%arg0: i32) -> (i32, i32) {
    %c0_i32 = arith.constant 0 : i32
    %c0_i32_0 = arith.constant 0 : i32
    %c0_i32_1 = arith.constant 0 : i32
    return %c0_i32, %c0_i32_0 : i32, i32
  }
  func.func @transform_3(%arg0: i32) -> (i32, i32) {
    %c0_i32 = arith.constant 0 : i32
    %c0_i32_0 = arith.constant 0 : i32
    %c0_i32_1 = arith.constant 0 : i32
    return %c0_i32, %c0_i32_0 : i32, i32
  }
  func.func @transform_4(%arg0: i32) -> (i32, i32) {
    %c0_i32 = arith.constant 0 : i32
    %c0_i32_0 = arith.constant 0 : i32
    %c0_i32_1 = arith.constant 0 : i32
    return %c0_i32, %c0_i32_0 : i32, i32
  }
  func.func @transform_5(%arg0: i32) -> (i32, i32) {
    %c0_i32 = arith.constant 0 : i32
    %c0_i32_0 = arith.constant 0 : i32
    %c0_i32_1 = arith.constant 0 : i32
    return %c0_i32, %c0_i32_0 : i32, i32
  }
  func.func @transform_6(%arg0: i32) -> (i32, i32) {
    %c0_i32 = arith.constant 0 : i32
    %c0_i32_0 = arith.constant 0 : i32
    %c0_i32_1 = arith.constant 0 : i32
    return %c0_i32, %c0_i32_0 : i32, i32
  }
  func.func @transform_7(%arg0: i32) -> (i32, i32) {
    %c0_i32 = arith.constant 0 : i32
    %c0_i32_0 = arith.constant 0 : i32
    %c0_i32_1 = arith.constant 0 : i32
    return %c0_i32, %c0_i32_0 : i32, i32
  }
  func.func @transform_8(%arg0: i32) -> (i32, i32) {
    %c0_i32 = arith.constant 0 : i32
    %c0_i32_0 = arith.constant 0 : i32
    %c0_i32_1 = arith.constant 0 : i32
    return %c0_i32, %c0_i32_0 : i32, i32
  }
  func.func @transform_9(%arg0: i32) -> (i32, i32) {
    %c0_i32 = arith.constant 0 : i32
    %c0_i32_0 = arith.constant 0 : i32
    return %arg0, %c0_i32 : i32, i32
  }
}

</mosaic_0001>

<bundles_post_ra>
// kernel: mlp_forward.1
= control target key start
LH: loop header
LB: loop body
LE: loop exit
PB: predicated region body
PF: predicated region fallthrough
CT: control target
= control target key end

     0   :  { %14 = vsyncpa [#allocation3], 0  ;;  %s2245_s0 = inlined_call_operand.vmem [shape: f32[8,16], index: 0, kind: input, shape index: {}]   ;;  %s2246_s1 = inlined_call_operand.hbm [shape: f32[16,128], index: 1, kind: input, shape index: {}]   ;;  %s2247_s2 = inlined_call_operand.vmem [shape: f32[1,128], index: 2, kind: input, shape index: {}]   ;;  %s2248_s3 = inlined_call_operand.vmem [shape: f32[128,128], index: 3, kind: input, shape index: {}]   ;;  %s2249_s4 = inlined_call_operand.vmem [shape: f32[1,128], index: 4, kind: input, shape index: {}]   ;;  %s2250_s5 = inlined_call_operand.hbm [shape: f32[128,128], index: 5, kind: input, shape index: {}]   ;;  %s2251_s6 = inlined_call_operand.vmem [shape: f32[1,128], index: 6, kind: input, shape index: {}]   ;;  %s2252_s7 = inlined_call_operand.vmem [shape: f32[128,8], index: 7, kind: input, shape index: {}]   ;;  %s2253_s8 = inlined_call_operand.vmem [shape: f32[1,8], index: 8, kind: input, shape index: {}]   ;;  %s2254_s9 = inlined_call_operand.vmem [shape: f32[8,8], index: 9, kind: output, shape index: {}]  }
   0x1   :  { %s22_s11 = sshll.u32 %s2246_s1, 4  ;;  %s23_s11 = int_to_ptr.hbm [resolvable:$true] %s22_s11 }
   0x2   :  { %15 = vsyncpa [#allocation5], 0  ;;  %s1388_s12 = smov [#allocation2]   ;;  %s41_s16 = sshll.u32 %s2250_s5, 4  ;;  %s42_s16 = int_to_ptr.hbm [resolvable:$true] %s41_s16 }
   0x3   :  { %s24_s13 = sshll.u32 %s1388_s12, 4  ;;  %s1389_s17 = smov 128   ;;  %s25_s13 = int_to_ptr.vmem [resolvable:$true] %s24_s13 }
   0x4   :  { %s1390_s18 = smov 8   ;;  %s1391_s19 = smov [#allocation4]  }
   0x5   :  { %30 = dma.hbm_to_vmem [thread:$0]  %s23_s11, 256, %s25_s13, [#allocation3], %s1389_s17, %s1389_s17, %s1390_s18  }
   0x6   :  { %s43_s20 = sshll.u32 %s1391_s19, 4  ;;  %s44_s20 = int_to_ptr.vmem [resolvable:$true] %s43_s20 }
   0x7   :  { %49 = dma.hbm_to_vmem [thread:$0]  %s42_s16, 2048, %s44_s20, [#allocation5], %s1389_s17, %s1389_s17, %s1390_s18  }
   0x8   :  { %1384 = dma.done.wait [#allocation3], 256  }
   0x9   :  { %1385 = vsyncadd [#allocation3], 4294967040 }
   0xa   :  { %1386 = dma.done.wait [#allocation5], 2048  }
   0xb   :  { %1387 = vsyncadd [#allocation5], 4294965248  ;;  %vm71_vm0 = vcmask 130048   ;;  %v66_v0 = vld [vmem:[#allocation2 + $0x8] sm:$0xff]  ;;  %v65_v1 = vld [vmem:[#allocation2] sm:$0xff]  ;;  %vm1320_vm1 = vcmask 64512  }
   0xc   :  { %v64_v2 = vld [vmem:[%s2245_s0] sm:$0xff]  ;;  %v1451_v3 = vand.u32 4294901760, %v66_v0  ;;  %v1453_v4 = vand.u32 4294901760, %v65_v1  ;;  %v250_v6 = vld [vmem:[%s2248_s3 + $0x78] sm:$0xff]  ;;  %v249_v7 = vld [vmem:[%s2248_s3 + $0x70] sm:$0xff] }
   0xd   :  { %v73_v5 = vsel %vm71_vm0, %v64_v2, 0  ;;  %v248_v8 = vld [vmem:[%s2248_s3 + $0x68] sm:$0xff]  ;;  %v1466_v10 = vand.u32 4294901760, %v250_v6  ;;  %v1468_v11 = vand.u32 4294901760, %v249_v7  ;;  %v247_v13 = vld [vmem:[%s2248_s3 + $0x60] sm:$0xff]  ;;  %v246_v14 = vld [vmem:[%s2248_s3 + $0x58] sm:$0xff] }
   0xe   :  { %v1464_v9 = vand.u32 4294901760, %v73_v5  ;;  %v1470_v12 = vand.u32 4294901760, %v248_v8  ;;  %90 = vmatpush.msra.mxu0 %v1451_v3  ;;  %v117_v15 = vsub.f32 %v66_v0, %v1451_v3  ;;  %v1481_v16 = vsub.f32 %v65_v1, %v1453_v4  ;;  %v245_v35 = vld [vmem:[%s2248_s3 + $0x50] sm:$0xff]  ;;  %v244_v40 = vld [vmem:[%s2248_s3 + $0x48] sm:$0xff]  ;;  %v243_v43 = vld [vmem:[%s2248_s3 + $0x40] sm:$0xff] }
   0xf   :  { %v1483_v17 = vand.u32 4294901760, %v247_v13  ;;  %v1485_v18 = vand.u32 4294901760, %v246_v14  ;;  %v1491_v20 = vsub.f32 %v250_v6, %v1466_v10  ;;  %v1494_v21 = vsub.f32 %v249_v7, %v1468_v11  ;;  %256 = vmatpush.msra.mxu2 %v1466_v10  ;;  %v242_v44 = vld [vmem:[%s2248_s3 + $0x38] sm:$0xff]  ;;  %v241_v45 = vld [vmem:[%s2248_s3 + $0x30] sm:$0xff]  ;;  %v240_v50 = vld [vmem:[%s2248_s3 + $0x28] sm:$0xff] }
  0x10   :  { %v1488_v19 = vsub.f32 %v73_v5, %v1464_v9  ;;  %v1497_v22 = vsub.f32 %v248_v8, %v1470_v12  ;;  %92 = vmatpush.msra.mxu0 %v1453_v4  ;;  %v118_v23 = vand.u32 4294901760, %v117_v15  ;;  %v124_v24 = vand.u32 4294901760, %v1481_v16  ;;  %v239_v58 = vld [vmem:[%s2248_s3 + $0x20] sm:$0xff]  ;;  %v238_v62 = vld [vmem:[%s2248_s3 + $0x18] sm:$0xff]  ;;  %v237_v8 = vld [vmem:[%s2248_s3 + $0x10] sm:$0xff] }
  0x11   :  { %v1503_v25 = vsub.f32 %v247_v13, %v1483_v17  ;;  %v1506_v26 = vsub.f32 %v246_v14, %v1485_v18  ;;  %v298_v28 = vand.u32 4294901760, %v1491_v20  ;;  %v304_v29 = vand.u32 4294901760, %v1494_v21  ;;  %258 = vmatpush.msra.mxu2 %v1468_v11 }
  0x12   :  { %v95_v27 = vand.u32 4294901760, %v1488_v19  ;;  %149 = vmatpush.msrb.mxu0 %v117_v15  ;;  %v310_v30 = vand.u32 4294901760, %v1497_v22  ;;  %v119_v31 = vsub.f32 %v117_v15, %v118_v23  ;;  %v125_v32 = vsub.f32 %v1481_v16, %v124_v24 }
  0x13   :  { %v316_v33 = vand.u32 4294901760, %v1503_v25  ;;  %v322_v34 = vand.u32 4294901760, %v1506_v26  ;;  %v299_v37 = vsub.f32 %v1491_v20, %v298_v28  ;;  %v305_v38 = vsub.f32 %v1494_v21, %v304_v29  ;;  %260 = vmatpush.msra.mxu2 %v1470_v12 }
  0x14   :  { %v96_v36 = vsub.f32 %v1488_v19, %v95_v27  ;;  %152 = vmatpush.msrb.mxu0 %v1481_v16  ;;  %v311_v39 = vsub.f32 %v1497_v22, %v310_v30  ;;  %v120_v41 = vand.u32 4294901760, %v119_v31  ;;  %v126_v42 = vand.u32 4294901760, %v125_v32 }
  0x15   :  { %v300_v47 = vand.u32 4294901760, %v299_v37  ;;  %v306_v48 = vand.u32 4294901760, %v305_v38  ;;  %v317_v49 = vsub.f32 %v1503_v25, %v316_v33  ;;  %v323_v51 = vsub.f32 %v1506_v26, %v322_v34  ;;  %262 = vmatpush.msra.mxu2 %v1483_v17 }
  0x16   :  { %v97_v46 = vand.u32 4294901760, %v96_v36  ;;  %121 = vmatpush.msra.mxu1 %v120_v41  ;;  %v1554_v52 = vand.u32 4294901760, %v245_v35  ;;  %v1556_v53 = vand.u32 4294901760, %v244_v40  ;;  %v312_v54 = vand.u32 4294901760, %v311_v39 }
  0x17   :  { %301 = vmatpush.msra.mxu3 %v300_v47  ;;  %v1559_v55 = vand.u32 4294901760, %v243_v43  ;;  %v1561_v56 = vand.u32 4294901760, %v242_v44  ;;  %v1563_v57 = vand.u32 4294901760, %v241_v45  ;;  %v1574_v61 = vand.u32 4294901760, %v240_v50  ;;  %264 = vmatpush.msra.mxu2 %v1485_v18 }
  0x18   :  { %98 = vmatmul.f32.vlgmr.msra.gmra.mxu0 %v97_v46  ;;  %127 = vmatpush.msra.mxu1 %v126_v42  ;;  %v1569_v59 = vsub.f32 %v245_v35, %v1554_v52  ;;  %v1572_v60 = vsub.f32 %v244_v40, %v1556_v53  ;;  %v318_v63 = vand.u32 4294901760, %v317_v49  ;;  %v1592_v7 = vand.u32 4294901760, %v239_v58  ;;  %v236_v35 = vld [vmem:[%s2248_s3 + $0x8] sm:$0xff] }
  0x19   :  { %201 = vmatpush.msra.mxu0 %v118_v23  ;;  %129 = vmatmul.f32.vlgmr.msra.gmra.mxu1 %v1464_v9  ;;  %v1581_v0 = vsub.f32 %v243_v43, %v1559_v55  ;;  %v1584_v1 = vsub.f32 %v242_v44, %v1561_v56  ;;  %v1590_v6 = vsub.f32 %v241_v45, %v1563_v57  ;;  %v324_v13 = vand.u32 4294901760, %v323_v51 }
  0x1a   :  { %307 = vmatpush.msra.mxu3 %v306_v48  ;;  %174 = vmatpush.msrb.mxu1 %v1451_v3  ;;  %v328_v2 = vand.u32 4294901760, %v1569_v59  ;;  %v334_v5 = vand.u32 4294901760, %v1572_v60  ;;  %v1599_v15 = vand.u32 4294901760, %v238_v62  ;;  %v1610_v31 = vsub.f32 %v240_v50, %v1574_v61 }
  0x1b   :  { %205 = vmatpush.msra.mxu0 %v124_v24  ;;  %v340_v14 = vand.u32 4294901760, %v1581_v0  ;;  %v346_v24 = vand.u32 4294901760, %v1584_v1  ;;  %v1613_v32 = vand.u32 4294901760, %v237_v8  ;;  %266 = vmatpush.msra.mxu2 %v1554_v52  ;;  %v352_v38 = vand.u32 4294901760, %v1590_v6 }
  0x1c   :  { %313 = vmatpush.msra.mxu3 %v312_v54  ;;  %176 = vmatpush.msrb.mxu1 %v1453_v4  ;;  %v329_v16 = vsub.f32 %v1569_v59, %v328_v2  ;;  %v335_v23 = vsub.f32 %v1572_v60, %v334_v5  ;;  %v1624_v39 = vsub.f32 %v239_v58, %v1592_v7  ;;  %v358_v42 = vand.u32 4294901760, %v1610_v31 }
  0x1d   :  { %v341_v37 = vsub.f32 %v1581_v0, %v340_v14  ;;  %v347_v41 = vsub.f32 %v1584_v1, %v346_v24  ;;  %268 = vmatpush.msra.mxu2 %v1556_v53  ;;  %v1636_v43 = vand.u32 4294901760, %v236_v35  ;;  %v353_v44 = vsub.f32 %v1590_v6, %v352_v38 }
  0x1e   :  { %226 = vmatpush.msra.mxu1 %v1451_v3  ;;  %319 = vmatpush.msra.mxu3 %v318_v63  ;;  %v330_v36 = vand.u32 4294901760, %v329_v16  ;;  %v1629_v3 = vsub.f32 %v238_v62, %v1599_v15  ;;  %v336_v40 = vand.u32 4294901760, %v335_v23  ;;  %v364_v45 = vand.u32 4294901760, %v1624_v39 }
  0x1f   :  { %270 = vmatpush.msra.mxu2 %v1559_v55  ;;  %v1647_v46 = vsub.f32 %v237_v8, %v1613_v32  ;;  %v1657_v48 = vsub.f32 %v236_v35, %v1636_v43  ;;  %v354_v49 = vand.u32 4294901760, %v353_v44  ;;  %v235_v35 = vld [vmem:[%s2248_s3] sm:$0xff] }
  0x20   :  { %155 = vmatmul.f32.vlgmr.msrb.gmra.mxu0 %v1488_v19  ;;  %228 = vmatpush.msra.mxu1 %v1453_v4  ;;  %v342_v4 = vand.u32 4294901760, %v341_v37  ;;  %v348_v19 = vand.u32 4294901760, %v347_v41  ;;  %v370_v47 = vand.u32 4294901760, %v1629_v3  ;;  %v365_v50 = vsub.f32 %v1624_v39, %v364_v45 }
  0x21   :  { %325 = vmatpush.msra.mxu3 %v324_v13  ;;  %180 = vmatmul.f32.vlgmr.msrb.gmra.mxu1 %v95_v27  ;;  %v359_v27 = vsub.f32 %v1610_v31, %v358_v42  ;;  %v376_v51 = vand.u32 4294901760, %v1647_v46  ;;  %v382_v62 = vand.u32 4294901760, %v1657_v48 }
  0x22   :  { %399 = vmatpush.msrb.mxu0 %v1491_v20  ;;  %452 = vmatpush.msrb.mxu1 %v1466_v10  ;;  %v371_v58 = vsub.f32 %v1629_v3, %v370_v47  ;;  %v366_v63 = vand.u32 4294901760, %v365_v50 }
  0x23   :  { %331 = vmatpush.msra.mxu3 %v330_v36  ;;  %272 = vmatpush.msra.mxu2 %v1561_v56  ;;  %v360_v54 = vand.u32 4294901760, %v359_v27  ;;  %v377_v8 = vsub.f32 %v1647_v46, %v376_v51  ;;  %v285_v36 = vand.u32 4294901760, %v235_v35 }
  0x24   :  { %402 = vmatpush.msrb.mxu0 %v1494_v21  ;;  %454 = vmatpush.msrb.mxu1 %v1468_v11  ;;  %v372_v13 = vand.u32 4294901760, %v371_v58  ;;  %v612_v21 = vld [vmem:[#allocation4 + $0x78] sm:$0xff]  ;;  %v602_v58 = vld [vmem:[#allocation4 + $0x28] sm:$0xff] }
  0x25   :  { %337 = vmatpush.msra.mxu3 %v336_v40  ;;  %274 = vmatpush.msra.mxu2 %v1563_v57  ;;  %v378_v16 = vand.u32 4294901760, %v377_v8  ;;  %v387_v37 = vsub.f32 %v235_v35, %v285_v36  ;;  %v601_v8 = vld [vmem:[#allocation4 + $0x20] sm:$0xff] }
  0x26   :  { %405 = vmatpush.msrb.mxu0 %v1497_v22  ;;  %456 = vmatpush.msrb.mxu1 %v1470_v12  ;;  %v611_v22 = vld [vmem:[#allocation4 + $0x70] sm:$0xff] }
  0x27   :  { %343 = vmatpush.msra.mxu3 %v342_v4  ;;  %276 = vmatpush.msra.mxu2 %v1574_v61  ;;  %v388_v40 = vand.u32 4294901760, %v387_v37 }
  0x28   :  { %207 = vmatmul.f32.vlgmr.msra.gmra.mxu0 %v1464_v9  ;;  %458 = vmatpush.msrb.mxu1 %v1483_v17 }
  0x29   :  { %349 = vmatpush.msra.mxu3 %v348_v19  ;;  %230 = vmatmul.f32.vlgmr.msra.gmra.mxu1 %v1464_v9  ;;  %v383_v9 = vsub.f32 %v1657_v48, %v382_v62  ;;  %v389_v41 = vsub.f32 %v387_v37, %v388_v40 }
  0x2a   :  { %408 = vmatpush.msrb.mxu0 %v1503_v25  ;;  %278 = vmatpush.msra.mxu2 %v1592_v7  ;;  %v610_v25 = vld [vmem:[#allocation4 + $0x68] sm:$0xff] }
  0x2b   :  { %355 = vmatpush.msra.mxu3 %v354_v49  ;;  %460 = vmatpush.msrb.mxu1 %v1485_v18  ;;  %v384_v23 = vand.u32 4294901760, %v383_v9  ;;  %v390_v4 = vand.u32 4294901760, %v389_v41  ;;  %v600_v41 = vld [vmem:[#allocation4 + $0x18] sm:$0xff] }
  0x2c   :  { %411 = vmatpush.msrb.mxu0 %v1506_v26  ;;  %280 = vmatpush.msra.mxu2 %v1599_v15 }
  0x2d   :  { %361 = vmatpush.msra.mxu3 %v360_v54  ;;  %462 = vmatpush.msrb.mxu1 %v1554_v52 }
  0x2e   :  { %414 = vmatpush.msrb.mxu0 %v1569_v59  ;;  %282 = vmatpush.msra.mxu2 %v1613_v32  ;;  %v606_v59 = vld [vmem:[#allocation4 + $0x48] sm:$0xff] }
  0x2f   :  { %367 = vmatpush.msra.mxu3 %v366_v63  ;;  %464 = vmatpush.msrb.mxu1 %v1556_v53 }
  0x30   :  { %417 = vmatpush.msrb.mxu0 %v1572_v60  ;;  %284 = vmatpush.msra.mxu2 %v1636_v43  ;;  %v605_v60 = vld [vmem:[#allocation4 + $0x40] sm:$0xff] }
  0x31   :  { %373 = vmatpush.msra.mxu3 %v372_v13  ;;  %466 = vmatpush.msrb.mxu1 %v1559_v55 }
  0x32   :  { %420 = vmatpush.msrb.mxu0 %v1581_v0  ;;  %286 = vmatpush.msra.mxu2 %v285_v36 }
  0x33   :  { %379 = vmatpush.msra.mxu3 %v378_v16  ;;  %468 = vmatpush.msrb.mxu1 %v1561_v56 }
  0x34   :  { %423 = vmatpush.msrb.mxu0 %v1584_v1  ;;  %493 = vmatpush.msrb.mxu2 %v298_v28  ;;  %v1759_v28 = vand.u32 4294901760, %v612_v21 }
  0x35   :  { %385 = vmatpush.msra.mxu3 %v384_v23  ;;  %470 = vmatpush.msrb.mxu1 %v1563_v57 }
  0x36   :  { %426 = vmatpush.msrb.mxu0 %v1590_v6  ;;  %497 = vmatpush.msrb.mxu2 %v304_v29  ;;  %v1761_v29 = vand.u32 4294901760, %v611_v22 }
  0x37   :  { %472 = vmatpush.msrb.mxu1 %v1574_v61  ;;  %391 = vmatpush.msra.mxu3 %v390_v4 }
  0x38   :  { %429 = vmatpush.msrb.mxu0 %v1610_v31  ;;  %501 = vmatpush.msrb.mxu2 %v310_v30  ;;  %v1763_v30 = vand.u32 4294901760, %v610_v25  ;;  %v1775_v0 = vsub.f32 %v611_v22, %v1761_v29  ;;  %v1796_v31 = vand.u32 4294901760, %v605_v60 }
  0x39   :  { %474 = vmatpush.msrb.mxu1 %v1592_v7  ;;  %560 = vmatpush.msrb.mxu3 %v1466_v10 }
  0x3a   :  { %432 = vmatpush.msrb.mxu0 %v1624_v39  ;;  %505 = vmatpush.msrb.mxu2 %v316_v33  ;;  %v609_v33 = vld [vmem:[#allocation4 + $0x60] sm:$0xff]  ;;  %v1778_v1 = vsub.f32 %v610_v25, %v1763_v30  ;;  %v1819_v54 = vsub.f32 %v605_v60, %v1796_v31  ;;  %v1853_v25 = vand.u32 4294901760, %v600_v41 }
  0x3b   :  { %476 = vmatpush.msrb.mxu1 %v1599_v15  ;;  %562 = vmatpush.msrb.mxu3 %v1468_v11  ;;  %v1332_v11 = vld [vmem:[%s2247_s2] ss:$0 sm:$0xff] }
  0x3c   :  { %435 = vmatpush.msrb.mxu0 %v1629_v3  ;;  %509 = vmatpush.msrb.mxu2 %v322_v34  ;;  %v608_v34 = vld [vmem:[#allocation4 + $0x58] sm:$0xff]  ;;  %v702_v4 = vand.u32 4294901760, %v1819_v54 }
  0x3d   :  { %478 = vmatpush.msrb.mxu1 %v1613_v32  ;;  %564 = vmatpush.msrb.mxu3 %v1470_v12 }
  0x3e   :  { %438 = vmatpush.msrb.mxu0 %v1647_v46  ;;  %513 = vmatpush.msrb.mxu2 %v328_v2  ;;  %v1781_v2 = vand.u32 4294901760, %v606_v59 }
  0x3f   :  { %480 = vmatpush.msrb.mxu1 %v1636_v43  ;;  %566 = vmatpush.msrb.mxu3 %v1483_v17 }
  0x40   :  { %441 = vmatpush.msrb.mxu0 %v1657_v48  ;;  %517 = vmatpush.msrb.mxu2 %v334_v5  ;;  %v1800_v39 = vsub.f32 %v606_v59, %v1781_v2  ;;  %v603_v48 = vld [vmem:[#allocation4 + $0x30] sm:$0xff] }
  0x41   :  { %482 = vmatpush.msrb.mxu1 %v285_v36  ;;  %568 = vmatpush.msrb.mxu3 %v1485_v18  ;;  %v1828_v23 = vand.u32 4294901760, %v603_v48 }
  0x42   :  { %444 = vmatpush.msrb.mxu0 %v387_v37  ;;  %521 = vmatpush.msrb.mxu2 %v340_v14  ;;  %v696_v63 = vand.u32 4294901760, %v1800_v39 }
  0x43   :  { %570 = vmatpush.msrb.mxu3 %v1554_v52  ;;  %v607_v52 = vld [vmem:[#allocation4 + $0x50] sm:$0xff] }
  0x44   :  { %525 = vmatpush.msrb.mxu2 %v346_v24  ;;  %618 = vmatpush.msra.mxu0 %v1759_v28  ;;  %v672_v24 = vand.u32 4294901760, %v1778_v1 }
  0x45   :  { %572 = vmatpush.msrb.mxu3 %v1556_v53 }
  0x46   :  { %529 = vmatpush.msrb.mxu2 %v352_v38  ;;  %620 = vmatpush.msra.mxu0 %v1761_v29  ;;  %v673_v44 = vsub.f32 %v1778_v1, %v672_v24 }
  0x47   :  { %574 = vmatpush.msrb.mxu3 %v1559_v55  ;;  %v1765_v55 = vand.u32 4294901760, %v609_v33 }
  0x48   :  { %533 = vmatpush.msrb.mxu2 %v358_v42  ;;  %622 = vmatpush.msra.mxu0 %v1763_v30  ;;  %v674_v13 = vand.u32 4294901760, %v673_v44 }
  0x49   :  { %576 = vmatpush.msrb.mxu3 %v1561_v56  ;;  %v1767_v56 = vand.u32 4294901760, %v608_v34  ;;  %v1784_v5 = vsub.f32 %v609_v33, %v1765_v55 }
  0x4a   :  { %537 = vmatpush.msrb.mxu2 %v364_v45  ;;  %624 = vmatpush.msra.mxu0 %v1765_v55 }
  0x4b   :  { %578 = vmatpush.msrb.mxu3 %v1563_v57  ;;  %v1769_v57 = vand.u32 4294901760, %v607_v52  ;;  %v1787_v6 = vsub.f32 %v608_v34, %v1767_v56  ;;  %v678_v38 = vand.u32 4294901760, %v1784_v5  ;;  %v703_v34 = vsub.f32 %v1819_v54, %v702_v4 }
  0x4c   :  { %541 = vmatpush.msrb.mxu2 %v370_v47  ;;  %v604_v47 = vld [vmem:[#allocation4 + $0x38] sm:$0xff]  ;;  %626 = vmatpush.msra.mxu0 %v1767_v56 }
  0x4d   :  { %580 = vmatpush.msrb.mxu3 %v1574_v61  ;;  %v1772_v61 = vsub.f32 %v612_v21, %v1759_v28  ;;  %v684_v45 = vand.u32 4294901760, %v1787_v6  ;;  %v679_v19 = vsub.f32 %v1784_v5, %v678_v38  ;;  %v1826_v16 = vand.u32 4294901760, %v604_v47 }
  0x4e   :  { %545 = vmatpush.msrb.mxu2 %v376_v51  ;;  %628 = vmatpush.msra.mxu0 %v1769_v57  ;;  %v704_v44 = vand.u32 4294901760, %v703_v34 }
  0x4f   :  { %582 = vmatpush.msrb.mxu3 %v1592_v7  ;;  %v1790_v7 = vsub.f32 %v607_v52, %v1769_v57  ;;  %v660_v14 = vand.u32 4294901760, %v1772_v61  ;;  %v685_v9 = vsub.f32 %v1787_v6, %v684_v45 }
  0x50   :  { %549 = vmatpush.msrb.mxu2 %v382_v62  ;;  %630 = vmatpush.msra.mxu0 %v1781_v2 }
  0x51   :  { %584 = vmatpush.msrb.mxu3 %v1599_v15  ;;  %v666_v15 = vand.u32 4294901760, %v1775_v0  ;;  %v661_v42 = vsub.f32 %v1772_v61, %v660_v14  ;;  %v690_v27 = vand.u32 4294901760, %v1790_v7 }
  0x52   :  { %553 = vmatpush.msrb.mxu2 %v388_v40  ;;  %v1833_v40 = vand.u32 4294901760, %v602_v58  ;;  %632 = vmatpush.msra.mxu0 %v1796_v31 }
  0x53   :  { %586 = vmatpush.msrb.mxu3 %v1613_v32  ;;  %v662_v50 = vand.u32 4294901760, %v661_v42  ;;  %v691_v37 = vsub.f32 %v1790_v7, %v690_v27  ;;  %v1870_v42 = vsub.f32 %v600_v41, %v1853_v25 }
  0x54   :  { %v1851_v22 = vsub.f32 %v602_v58, %v1833_v40  ;;  %634 = vmatpush.msra.mxu0 %v1826_v16 }
  0x55   :  { %588 = vmatpush.msrb.mxu3 %v1636_v43  ;;  %v667_v43 = vsub.f32 %v1775_v0, %v666_v15  ;;  %663 = vmatpush.msra.mxu1 %v662_v50  ;;  %v692_v33 = vand.u32 4294901760, %v691_v37  ;;  %v732_v50 = vand.u32 4294901760, %v1870_v42  ;;  %v598_v37 = vld [vmem:[#allocation4 + $0x8] sm:$0xff] }
  0x56   :  { %636 = vmatpush.msra.mxu0 %v1828_v23 }
  0x57   :  { %590 = vmatpush.msrb.mxu3 %v285_v36  ;;  %v668_v51 = vand.u32 4294901760, %v667_v43  ;;  %v680_v36 = vand.u32 4294901760, %v679_v19 }
  0x58   :  { %638 = vmatpush.msra.mxu0 %v1833_v40 }
  0x59   :  { %669 = vmatpush.msra.mxu1 %v668_v51 }
  0x5b   :  { %675 = vmatpush.msra.mxu1 %v674_v13 }
  0x5d   :  { %681 = vmatpush.msra.mxu1 %v680_v36 }
  0x95   :  { %v99_v10 = vpop.f32.mrf.mxu0 }
  0x96   :  { %v130_v12 = vpop.f32.mrf.mxu1  ;;  %v100_v17 = vadd.f32 %v1332_v11, %v99_v10  ;;  %v1837_v10 = vsub.f32 %v604_v47, %v1826_v16  ;;  %v1841_v11 = vsub.f32 %v603_v48, %v1828_v23 }
  0x98   :  { %v131_v20 = vadd.f32 %v130_v12, %v100_v17  ;;  %v1843_v12 = vand.u32 4294901760, %v601_v8  ;;  %v708_v21 = vand.u32 4294901760, %v1837_v10  ;;  %v714_v52 = vand.u32 4294901760, %v1841_v11 }
  0x9a   :  { %640 = vmatpush.msra.mxu0 %v1843_v12 }
  0x9c   :  { %642 = vmatpush.msra.mxu0 %v1853_v25 }
  0x9d   :  { %v156_v18 = vpop.f32.mrf.mxu0 }
  0x9e   :  { %v181_v26 = vpop.f32.mrf.mxu1  ;;  %v157_v53 = vadd.f32 %v156_v18, %v131_v20  ;;  %v697_v18 = vsub.f32 %v1800_v39, %v696_v63  ;;  %v686_v20 = vand.u32 4294901760, %v685_v9 }
  0xa0   :  { %v182_v32 = vadd.f32 %v181_v26, %v157_v53  ;;  %v1861_v53 = vsub.f32 %v601_v8, %v1843_v12  ;;  %687 = vmatpush.msra.mxu1 %v686_v20  ;;  %v698_v60 = vand.u32 4294901760, %v697_v18  ;;  %v733_v8 = vsub.f32 %v1870_v42, %v732_v50  ;;  %v597_v18 = vld [vmem:[#allocation4] sm:$0xff] }
  0xa2   :  { %693 = vmatpush.msra.mxu1 %v692_v33  ;;  %v726_v19 = vand.u32 4294901760, %v1861_v53  ;;  %v734_v9 = vand.u32 4294901760, %v733_v8  ;;  %v647_v33 = vand.u32 4294901760, %v597_v18  ;;  %v966_v8 = vld [vmem:[%s2252_s7 + $0x38] sm:$0xff] }
  0xa4   :  { %699 = vmatpush.msra.mxu1 %v698_v60  ;;  %v727_v58 = vsub.f32 %v1861_v53, %v726_v19  ;;  %v749_v60 = vsub.f32 %v597_v18, %v647_v33 }
  0xa5   :  { %v208_v3 = vpop.f32.mrf.mxu0 }
  0xa6   :  { %v209_v46 = vadd.f32 %v208_v3, %v182_v32  ;;  %v231_v49 = vpop.f32.mrf.mxu1  ;;  %v709_v32 = vsub.f32 %v1837_v10, %v708_v21  ;;  %v720_v3 = vand.u32 4294901760, %v1851_v22  ;;  %705 = vmatpush.msra.mxu1 %v704_v44  ;;  %v728_v13 = vand.u32 4294901760, %v727_v58 }
  0xa7   :  { %v750_v44 = vand.u32 4294901760, %v749_v60 }
  0xa8   :  { %v232_v62 = vadd.f32 %v231_v49, %v209_v46  ;;  %v715_v46 = vsub.f32 %v1841_v11, %v714_v52  ;;  %v710_v48 = vand.u32 4294901760, %v709_v32  ;;  %v721_v49 = vsub.f32 %v1851_v22, %v720_v3 }
  0xaa   :  { %v234_v35 = vmax.f32 %v232_v62, 0.0  ;;  %v716_v51 = vand.u32 4294901760, %v715_v46  ;;  %711 = vmatpush.msra.mxu1 %v710_v48  ;;  %v722_v62 = vand.u32 4294901760, %v721_v49 }
  0xac   :  { %v287_v17 = vand.u32 4294901760, %v234_v35  ;;  %717 = vmatpush.msra.mxu1 %v716_v51 }
  0xae   :  { %v288_v26 = vsub.f32 %v234_v35, %v287_v17  ;;  %393 = vmatmul.f32.vlgmr.msra.gmra.mxu3 %v287_v17  ;;  %723 = vmatpush.msra.mxu1 %v722_v62  ;;  %v599_v35 = vld [vmem:[#allocation4 + $0x10] sm:$0xff] }
  0xaf   :  { %814 = vmatpush.msra.mxu3 %v1759_v28  ;;  %v643_v36 = vand.u32 4294901760, %v599_v35  ;;  %v967_v62 = vld [vmem:[%s2252_s7 + $0x40] sm:$0xff] }
  0xb0   :  { %447 = vmatmul.f32.vlgmr.msrb.gmra.mxu0 %v288_v26  ;;  %v289_v59 = vand.u32 4294901760, %v288_v26  ;;  %729 = vmatpush.msra.mxu1 %v728_v13  ;;  %v965_v13 = vld [vmem:[%s2252_s7 + $0x30] sm:$0xff] }
  0xb1   :  { %816 = vmatpush.msra.mxu3 %v1761_v29  ;;  %v737_v41 = vsub.f32 %v599_v35, %v643_v36  ;;  %644 = vmatpush.msra.mxu0 %v643_v36 }
  0xb2   :  { %486 = vmatmul.f32.vlgmr.msrb.gmra.mxu1 %v289_v59  ;;  %v290_v43 = vsub.f32 %v288_v26, %v289_v59 }
  0xb3   :  { %818 = vmatpush.msra.mxu3 %v1763_v30  ;;  %735 = vmatpush.msra.mxu1 %v734_v9  ;;  %v738_v20 = vand.u32 4294901760, %v737_v41 }
  0xb4   :  { %v291_v47 = vand.u32 4294901760, %v290_v43 }
  0xb5   :  { %820 = vmatpush.msra.mxu3 %v1765_v55  ;;  %v739_v34 = vsub.f32 %v737_v41, %v738_v20 }
  0xb6   :  { %292 = vmatmul.f32.vlgmr.msra.gmra.mxu2 %v291_v47  ;;  %592 = vmatmul.f32.vlgmr.msrb.gmra.mxu3 %v287_v17  ;;  %v751_v47 = vsub.f32 %v749_v60, %v750_v44 }
  0xb7   :  { %761 = vmatpush.msra.mxu2 %v1772_v61  ;;  %822 = vmatpush.msra.mxu3 %v1767_v56  ;;  %v740_v32 = vand.u32 4294901760, %v739_v34  ;;  %v972_v61 = vld [vmem:[%s2252_s7 + $0x68] sm:$0xff]  ;;  %v2057_v34 = vand.u32 4294901760, %v966_v8 }
  0xb8   :  { %v752_v48 = vand.u32 4294901760, %v751_v47 }
  0xb9   :  { %764 = vmatpush.msra.mxu2 %v1775_v0  ;;  %824 = vmatpush.msra.mxu3 %v1769_v57 }
  0xba   :  { %741 = vmatpush.msra.mxu1 %v740_v32 }
  0xbb   :  { %767 = vmatpush.msra.mxu2 %v1778_v1  ;;  %826 = vmatpush.msra.mxu3 %v1781_v2 }
  0xbd   :  { %770 = vmatpush.msra.mxu2 %v1784_v5  ;;  %828 = vmatpush.msra.mxu3 %v1796_v31  ;;  %v971_v5 = vld [vmem:[%s2252_s7 + $0x60] sm:$0xff] }
  0xbe   :  { %555 = vmatmul.f32.vlgmr.msrb.gmra.mxu2 %v287_v17  ;;  %v645_v17 = vand.u32 4294901760, %v598_v37 }
  0xbf   :  { %773 = vmatpush.msra.mxu2 %v1787_v6  ;;  %830 = vmatpush.msra.mxu3 %v1826_v16  ;;  %v970_v6 = vld [vmem:[%s2252_s7 + $0x58] sm:$0xff] }
  0xc0   :  { %v743_v26 = vsub.f32 %v598_v37, %v645_v17  ;;  %646 = vmatpush.msra.mxu0 %v645_v17  ;;  %v964_v37 = vld [vmem:[%s2252_s7 + $0x28] sm:$0xff] }
  0xc1   :  { %776 = vmatpush.msra.mxu2 %v1790_v7  ;;  %832 = vmatpush.msra.mxu3 %v1828_v23  ;;  %v969_v7 = vld [vmem:[%s2252_s7 + $0x50] sm:$0xff] }
  0xc2   :  { %v744_v59 = vand.u32 4294901760, %v743_v26  ;;  %648 = vmatpush.msra.mxu0 %v647_v33 }
  0xc3   :  { %779 = vmatpush.msra.mxu2 %v1800_v39  ;;  %834 = vmatpush.msra.mxu3 %v1833_v40 }
  0xc4   :  { %855 = vmatpush.msrb.mxu0 %v660_v14  ;;  %v745_v43 = vsub.f32 %v743_v26, %v744_v59 }
  0xc5   :  { %782 = vmatpush.msra.mxu2 %v1819_v54  ;;  %836 = vmatpush.msra.mxu3 %v1843_v12 }
  0xc6   :  { %859 = vmatpush.msrb.mxu0 %v666_v15  ;;  %v746_v46 = vand.u32 4294901760, %v745_v43  ;;  %v1981_v15 = vand.u32 4294901760, %v971_v5 }
  0xc7   :  { %785 = vmatpush.msra.mxu2 %v1837_v10  ;;  %838 = vmatpush.msra.mxu3 %v1853_v25 }
  0xc8   :  { %863 = vmatpush.msrb.mxu0 %v672_v24  ;;  %747 = vmatpush.msra.mxu1 %v746_v46  ;;  %v1983_v24 = vand.u32 4294901760, %v970_v6  ;;  %v962_v46 = vld [vmem:[%s2252_s7 + $0x18] sm:$0xff] }
  0xc9   :  { %788 = vmatpush.msra.mxu2 %v1841_v11  ;;  %840 = vmatpush.msra.mxu3 %v643_v36 }
  0xca   :  { %867 = vmatpush.msrb.mxu0 %v678_v38  ;;  %753 = vmatpush.msra.mxu1 %v752_v48  ;;  %v968_v38 = vld [vmem:[%s2252_s7 + $0x48] sm:$0xff]  ;;  %v2073_v48 = vsub.f32 %v966_v8, %v2057_v34 }
  0xcb   :  { %791 = vmatpush.msra.mxu2 %v1851_v22  ;;  %842 = vmatpush.msra.mxu3 %v645_v17 }
  0xcc   :  { %922 = vmatpush.msrb.mxu1 %v1759_v28  ;;  %871 = vmatpush.msrb.mxu0 %v684_v45  ;;  %v1333_v28 = vld [vmem:[%s2249_s4] ss:$0 sm:$0xff] }
  0xcd   :  { %794 = vmatpush.msra.mxu2 %v1861_v53  ;;  %844 = vmatpush.msra.mxu3 %v647_v33 }
  0xce   :  { %924 = vmatpush.msrb.mxu1 %v1761_v29  ;;  %875 = vmatpush.msrb.mxu0 %v690_v27 }
  0xcf   :  { %797 = vmatpush.msra.mxu2 %v1870_v42 }
  0xd0   :  { %926 = vmatpush.msrb.mxu1 %v1763_v30  ;;  %879 = vmatpush.msrb.mxu0 %v696_v63  ;;  %v2000_v63 = vand.u32 4294901760, %v968_v38 }
  0xd1   :  { %800 = vmatpush.msra.mxu2 %v737_v41 }
  0xd2   :  { %928 = vmatpush.msrb.mxu1 %v1765_v55  ;;  %883 = vmatpush.msrb.mxu0 %v702_v4  ;;  %v2018_v53 = vsub.f32 %v968_v38, %v2000_v63 }
  0xd3   :  { %803 = vmatpush.msra.mxu2 %v743_v26 }
  0xd4   :  { %930 = vmatpush.msrb.mxu1 %v1767_v56  ;;  %887 = vmatpush.msrb.mxu0 %v708_v21  ;;  %v974_v56 = vld [vmem:[%s2252_s7 + $0x78] sm:$0xff]  ;;  %v1058_v18 = vand.u32 4294901760, %v2018_v53 }
  0xd5   :  { %806 = vmatpush.msra.mxu2 %v749_v60  ;;  %v1966_v0 = vand.u32 4294901760, %v974_v56 }
  0xd6   :  { %932 = vmatpush.msrb.mxu1 %v1769_v57  ;;  %891 = vmatpush.msrb.mxu0 %v714_v52  ;;  %v973_v57 = vld [vmem:[%s2252_s7 + $0x70] sm:$0xff] }
  0xd7   :  { %v1968_v1 = vand.u32 4294901760, %v973_v57  ;;  %v1991_v45 = vsub.f32 %v974_v56, %v1966_v0  ;;  %980 = vmatpush.msrb.mxu2 %v1966_v0 }
  0xd8   :  { %934 = vmatpush.msrb.mxu1 %v1781_v2  ;;  %895 = vmatpush.msrb.mxu0 %v720_v3  ;;  %v1970_v2 = vand.u32 4294901760, %v972_v61 }
  0xd9   :  { %v1994_v27 = vsub.f32 %v973_v57, %v1968_v1  ;;  %v1022_v11 = vand.u32 4294901760, %v1991_v45  ;;  %982 = vmatpush.msrb.mxu2 %v1968_v1  ;;  %v1059_v57 = vsub.f32 %v2018_v53, %v1058_v18 }
  0xda   :  { %936 = vmatpush.msrb.mxu1 %v1796_v31  ;;  %899 = vmatpush.msrb.mxu0 %v726_v19  ;;  %v1985_v31 = vand.u32 4294901760, %v969_v7  ;;  %v1997_v54 = vsub.f32 %v972_v61, %v1970_v2 }
  0xdb   :  { %v1023_v42 = vsub.f32 %v1991_v45, %v1022_v11  ;;  %984 = vmatpush.msrb.mxu2 %v1970_v2 }
  0xdc   :  { %938 = vmatpush.msrb.mxu1 %v1826_v16  ;;  %903 = vmatpush.msrb.mxu0 %v732_v50  ;;  %v2009_v4 = vsub.f32 %v969_v7, %v1985_v31  ;;  %v1034_v21 = vand.u32 4294901760, %v1997_v54  ;;  %v2095_v7 = vand.u32 4294901760, %v962_v46 }
  0xdd   :  { %v1024_v35 = vand.u32 4294901760, %v1023_v42  ;;  %986 = vmatpush.msrb.mxu2 %v1981_v15  ;;  %v960_v42 = vld [vmem:[%s2252_s7 + $0x8] sm:$0xff] }
  0xde   :  { %940 = vmatpush.msrb.mxu1 %v1828_v23  ;;  %907 = vmatpush.msrb.mxu0 %v738_v20  ;;  %v2003_v23 = vsub.f32 %v971_v5, %v1981_v15  ;;  %v1035_v49 = vsub.f32 %v1997_v54, %v1034_v21  ;;  %v1052_v58 = vand.u32 4294901760, %v2009_v4  ;;  %v963_v20 = vld [vmem:[%s2252_s7 + $0x20] sm:$0xff]  ;;  %v1070_v5 = vand.u32 4294901760, %v2073_v48 }
  0xdf   :  { %1025 = vmatpush.msrb.mxu3 %v1024_v35  ;;  %988 = vmatpush.msrb.mxu2 %v1983_v24 }
  0xe0   :  { %942 = vmatpush.msrb.mxu1 %v1833_v40  ;;  %911 = vmatpush.msrb.mxu0 %v744_v59  ;;  %v2006_v40 = vsub.f32 %v970_v6, %v1983_v24  ;;  %v1036_v26 = vand.u32 4294901760, %v1035_v49  ;;  %v2059_v59 = vand.u32 4294901760, %v965_v13  ;;  %v1053_v43 = vsub.f32 %v2009_v4, %v1052_v58 }
  0xe1   :  { %990 = vmatpush.msrb.mxu2 %v1985_v31  ;;  %v1071_v49 = vsub.f32 %v2073_v48, %v1070_v5 }
  0xe2   :  { %944 = vmatpush.msrb.mxu1 %v1843_v12  ;;  %915 = vmatpush.msrb.mxu0 %v750_v44  ;;  %v1028_v12 = vand.u32 4294901760, %v1994_v27  ;;  %v1046_v52 = vand.u32 4294901760, %v2006_v40  ;;  %v2064_v44 = vand.u32 4294901760, %v964_v37 }
  0xe3   :  { %992 = vmatpush.msrb.mxu2 %v2000_v63 }
  0xe4   :  { %946 = vmatpush.msrb.mxu1 %v1853_v25  ;;  %v1040_v25 = vand.u32 4294901760, %v2003_v23  ;;  %v1029_v19 = vsub.f32 %v1994_v27, %v1028_v12  ;;  %v2093_v6 = vsub.f32 %v964_v37, %v2064_v44 }
  0xe6   :  { %948 = vmatpush.msrb.mxu1 %v643_v36  ;;  %v1041_v51 = vsub.f32 %v2003_v23, %v1040_v25  ;;  %v1030_v36 = vand.u32 4294901760, %v1029_v19  ;;  %v1060_v19 = vand.u32 4294901760, %v1059_v57 }
  0xe8   :  { %950 = vmatpush.msrb.mxu1 %v645_v17  ;;  %v1047_v17 = vsub.f32 %v2006_v40, %v1046_v52  ;;  %v1042_v32 = vand.u32 4294901760, %v1041_v51  ;;  %1031 = vmatpush.msrb.mxu3 %v1030_v36  ;;  %v2119_v51 = vsub.f32 %v962_v46, %v2095_v7  ;;  %v2130_v36 = vand.u32 4294901760, %v960_v42 }
  0xea   :  { %952 = vmatpush.msrb.mxu1 %v647_v33  ;;  %v2054_v33 = vand.u32 4294901760, %v967_v62  ;;  %v1048_v56 = vand.u32 4294901760, %v1047_v17  ;;  %1037 = vmatpush.msrb.mxu3 %v1036_v26  ;;  %v2139_v26 = vsub.f32 %v960_v42, %v2130_v36 }
  0xec   :  { %v2070_v47 = vsub.f32 %v967_v62, %v2054_v33  ;;  %1043 = vmatpush.msrb.mxu3 %v1042_v32  ;;  %994 = vmatpush.msrb.mxu2 %v2054_v33 }
  0xee   :  { %v1064_v61 = vand.u32 4294901760, %v2070_v47  ;;  %1049 = vmatpush.msrb.mxu3 %v1048_v56  ;;  %996 = vmatpush.msrb.mxu2 %v2057_v34  ;;  %v1106_v56 = vand.u32 4294901760, %v2139_v26 }
  0xf0   :  { %998 = vmatpush.msrb.mxu2 %v2059_v59 }
  0xf2   :  { %1000 = vmatpush.msrb.mxu2 %v2064_v44 }
 0x12d   :  { %v448_v39 = vpop.f32.mrf.mxu0 }
 0x12f   :  { %v487_v10 = vpop.f32.mrf.mxu1 }
 0x131   :  { %v394_v29 = vpop.f32.mrf.mxu3 }
 0x139   :  { %v293_v30 = vpop.f32.mrf.mxu2  ;;  %v593_v9 = vpop.f32.mrf.mxu3 }
 0x13a   :  { %v294_v55 = vadd.f32 %v1333_v28, %v293_v30  ;;  %v2077_v28 = vsub.f32 %v965_v13, %v2059_v59  ;;  %v961_v30 = vld [vmem:[%s2252_s7 + $0x10] sm:$0xff] }
 0x13b   :  { %v2099_v38 = vand.u32 4294901760, %v961_v30 }
 0x13c   :  { %v395_v14 = vadd.f32 %v394_v29, %v294_v55  ;;  %v2079_v29 = vand.u32 4294901760, %v963_v20 }
 0x13d   :  { %v2122_v8 = vsub.f32 %v961_v30, %v2099_v38 }
 0x13e   :  { %v449_v16 = vadd.f32 %v448_v39, %v395_v14  ;;  %v1054_v39 = vand.u32 4294901760, %v1053_v43  ;;  %1002 = vmatpush.msrb.mxu2 %v2079_v29 }
 0x13f   :  { %v1100_v43 = vand.u32 4294901760, %v2122_v8 }
 0x140   :  { %v488_v22 = vadd.f32 %v487_v10, %v449_v16  ;;  %v1065_v16 = vsub.f32 %v2070_v47, %v1064_v61  ;;  %v1076_v10 = vand.u32 4294901760, %v2077_v28  ;;  %1055 = vmatpush.msrb.mxu3 %v1054_v39  ;;  %1004 = vmatpush.msrb.mxu2 %v2095_v7 }
 0x141   :  { %v556_v3 = vpop.f32.mrf.mxu2 }
 0x142   :  { %v557_v50 = vadd.f32 %v556_v3, %v488_v22  ;;  %v2107_v22 = vsub.f32 %v963_v20, %v2079_v29  ;;  %v1066_v13 = vand.u32 4294901760, %v1065_v16  ;;  %1061 = vmatpush.msrb.mxu3 %v1060_v19  ;;  %v1094_v20 = vand.u32 4294901760, %v2119_v51  ;;  %1006 = vmatpush.msrb.mxu2 %v2099_v38 }
 0x143   :  { %v1107_v16 = vsub.f32 %v2139_v26, %v1106_v56 }
 0x144   :  { %v594_v41 = vadd.f32 %v593_v9, %v557_v50  ;;  %v1082_v50 = vand.u32 4294901760, %v2093_v6  ;;  %v1077_v9 = vsub.f32 %v2077_v28, %v1076_v10  ;;  %v1088_v35 = vand.u32 4294901760, %v2107_v22  ;;  %1067 = vmatpush.msrb.mxu3 %v1066_v13  ;;  %1008 = vmatpush.msrb.mxu2 %v2130_v36 }
 0x145   :  { %v1095_v30 = vsub.f32 %v2119_v51, %v1094_v20  ;;  %v1108_v42 = vand.u32 4294901760, %v1107_v16 }
 0x146   :  { %v596_v60 = vmax.f32 %v594_v41, 0.0  ;;  %v1072_v41 = vand.u32 4294901760, %v1071_v49  ;;  %v1083_v17 = vsub.f32 %v2093_v6, %v1082_v50  ;;  %v1089_v32 = vsub.f32 %v2107_v22, %v1088_v35 }
 0x147   :  { %v1096_v39 = vand.u32 4294901760, %v1095_v30 }
 0x148   :  { %v2084_v55 = vand.u32 4294901760, %v596_v60  ;;  %1073 = vmatpush.msrb.mxu3 %v1072_v41  ;;  %v1084_v46 = vand.u32 4294901760, %v1083_v17  ;;  %v1090_v57 = vand.u32 4294901760, %v1089_v32 }
 0x14a   :  { %v650_v14 = vsub.f32 %v596_v60, %v2084_v55  ;;  %755 = vmatmul.f32.vlgmr.msra.gmra.mxu1 %v2084_v55  ;;  %v1078_v60 = vand.u32 4294901760, %v1077_v9 }
 0x14b   :  { %1176 = vmatpush.msra.mxu1 %v1966_v0 }
 0x14c   :  { %809 = vmatmul.f32.vlgmr.msra.gmra.mxu2 %v650_v14  ;;  %v651_v3 = vand.u32 4294901760, %v650_v14  ;;  %1079 = vmatpush.msrb.mxu3 %v1078_v60 }
 0x14d   :  { %1178 = vmatpush.msra.mxu1 %v1968_v1 }
 0x14e   :  { %848 = vmatmul.f32.vlgmr.msra.gmra.mxu3 %v651_v3  ;;  %v652_v62 = vsub.f32 %v650_v14, %v651_v3  ;;  %v1101_v14 = vsub.f32 %v2122_v8, %v1100_v43 }
 0x14f   :  { %1180 = vmatpush.msra.mxu1 %v1970_v2  ;;  %1085 = vmatpush.msrb.mxu3 %v1084_v46 }
 0x150   :  { %v653_v37 = vand.u32 4294901760, %v652_v62  ;;  %v1102_v3 = vand.u32 4294901760, %v1101_v14 }
 0x151   :  { %1182 = vmatpush.msra.mxu1 %v1981_v15  ;;  %1091 = vmatpush.msrb.mxu3 %v1090_v57 }
 0x152   :  { %654 = vmatmul.f32.vlgmr.msra.gmra.mxu0 %v653_v37  ;;  %954 = vmatmul.f32.vlgmr.msrb.gmra.mxu1 %v2084_v55 }
 0x153   :  { %1123 = vmatpush.msra.mxu0 %v1991_v45  ;;  %1184 = vmatpush.msra.mxu1 %v1983_v24 }
 0x154   :  { %1097 = vmatpush.msrb.mxu3 %v1096_v39 }
 0x155   :  { %1126 = vmatpush.msra.mxu0 %v1994_v27  ;;  %1186 = vmatpush.msra.mxu1 %v1985_v31 }
 0x156   :  { %1103 = vmatpush.msrb.mxu3 %v1102_v3 }
 0x157   :  { %1129 = vmatpush.msra.mxu0 %v1997_v54  ;;  %1188 = vmatpush.msra.mxu1 %v2000_v63 }
 0x158   :  { %1109 = vmatpush.msrb.mxu3 %v1108_v42 }
 0x159   :  { %1132 = vmatpush.msra.mxu0 %v2003_v23  ;;  %1190 = vmatpush.msra.mxu1 %v2054_v33 }
 0x15a   :  { %917 = vmatmul.f32.vlgmr.msrb.gmra.mxu0 %v2084_v55  ;;  %v959_v55 = vld [vmem:[%s2252_s7] sm:$0xff] }
 0x15b   :  { %1135 = vmatpush.msra.mxu0 %v2006_v40  ;;  %1192 = vmatpush.msra.mxu1 %v2057_v34  ;;  %v1009_v19 = vand.u32 4294901760, %v959_v55 }
 0x15d   :  { %1138 = vmatpush.msra.mxu0 %v2009_v4  ;;  %1194 = vmatpush.msra.mxu1 %v2059_v59  ;;  %v1111_v49 = vsub.f32 %v959_v55, %v1009_v19 }
 0x15e   :  { %1010 = vmatpush.msrb.mxu2 %v1009_v19 }
 0x15f   :  { %1141 = vmatpush.msra.mxu0 %v2018_v53  ;;  %1196 = vmatpush.msra.mxu1 %v2064_v44  ;;  %v1112_v62 = vand.u32 4294901760, %v1111_v49 }
 0x160   :  { %1217 = vmatpush.msra.mxu2 %v1022_v11 }
 0x161   :  { %1144 = vmatpush.msra.mxu0 %v2070_v47  ;;  %1198 = vmatpush.msra.mxu1 %v2079_v29  ;;  %v1113_v13 = vsub.f32 %v1111_v49, %v1112_v62 }
 0x162   :  { %1221 = vmatpush.msra.mxu2 %v1028_v12 }
 0x163   :  { %1147 = vmatpush.msra.mxu0 %v2073_v48  ;;  %1200 = vmatpush.msra.mxu1 %v2095_v7  ;;  %v1114_v9 = vand.u32 4294901760, %v1113_v13 }
 0x164   :  { %1225 = vmatpush.msra.mxu2 %v1034_v21 }
 0x165   :  { %1150 = vmatpush.msra.mxu0 %v2077_v28  ;;  %1202 = vmatpush.msra.mxu1 %v2099_v38 }
 0x166   :  { %1229 = vmatpush.msra.mxu2 %v1040_v25  ;;  %1115 = vmatpush.msrb.mxu3 %v1114_v9 }
 0x167   :  { %1153 = vmatpush.msra.mxu0 %v2093_v6  ;;  %1204 = vmatpush.msra.mxu1 %v2130_v36 }
 0x168   :  { %1284 = vmatpush.msra.mxu3 %v1966_v0  ;;  %1233 = vmatpush.msra.mxu2 %v1046_v52  ;;  %v1334_v0 = vld [vmem:[%s2251_s6] ss:$0 sm:$0xff] }
 0x169   :  { %1156 = vmatpush.msra.mxu0 %v2107_v22  ;;  %1206 = vmatpush.msra.mxu1 %v1009_v19 }
 0x16a   :  { %1286 = vmatpush.msra.mxu3 %v1968_v1  ;;  %1237 = vmatpush.msra.mxu2 %v1052_v58  ;;  %v1335_v58 = vld [vmem:[%s2253_s8] ss:$0 sm:$0xff] }
 0x16b   :  { %1159 = vmatpush.msra.mxu0 %v2119_v51 }
 0x16c   :  { %1288 = vmatpush.msra.mxu3 %v1970_v2  ;;  %1241 = vmatpush.msra.mxu2 %v1058_v18 }
 0x16d   :  { %1162 = vmatpush.msra.mxu0 %v2122_v8 }
 0x16e   :  { %1290 = vmatpush.msra.mxu3 %v1981_v15  ;;  %1245 = vmatpush.msra.mxu2 %v1064_v61 }
 0x16f   :  { %1165 = vmatpush.msra.mxu0 %v2139_v26 }
 0x170   :  { %1292 = vmatpush.msra.mxu3 %v1983_v24  ;;  %1249 = vmatpush.msra.mxu2 %v1070_v5 }
 0x171   :  { %1168 = vmatpush.msra.mxu0 %v1111_v49 }
 0x172   :  { %1294 = vmatpush.msra.mxu3 %v1985_v31  ;;  %1253 = vmatpush.msra.mxu2 %v1076_v10 }
 0x174   :  { %1296 = vmatpush.msra.mxu3 %v2000_v63  ;;  %1257 = vmatpush.msra.mxu2 %v1082_v50 }
 0x176   :  { %1298 = vmatpush.msra.mxu3 %v2054_v33  ;;  %1261 = vmatpush.msra.mxu2 %v1088_v35 }
 0x178   :  { %1300 = vmatpush.msra.mxu3 %v2057_v34  ;;  %1265 = vmatpush.msra.mxu2 %v1094_v20 }
 0x17a   :  { %1302 = vmatpush.msra.mxu3 %v2059_v59  ;;  %1269 = vmatpush.msra.mxu2 %v1100_v43 }
 0x17c   :  { %1304 = vmatpush.msra.mxu3 %v2064_v44  ;;  %1273 = vmatpush.msra.mxu2 %v1106_v56 }
 0x17e   :  { %1306 = vmatpush.msra.mxu3 %v2079_v29  ;;  %1277 = vmatpush.msra.mxu2 %v1112_v62 }
 0x180   :  { %1308 = vmatpush.msra.mxu3 %v2095_v7 }
 0x182   :  { %1310 = vmatpush.msra.mxu3 %v2099_v38 }
 0x184   :  { %1312 = vmatpush.msra.mxu3 %v2130_v36 }
 0x186   :  { %1314 = vmatpush.msra.mxu3 %v1009_v19 }
 0x1c7   :  { %v756_v1 = vpop.f32.mrf.mxu1 }
 0x1cf   :  { %v655_v2 = vpop.f32.mrf.mxu0  ;;  %v810_v31 = vpop.f32.mrf.mxu2 }
 0x1d0   :  { %v656_v15 = vadd.f32 %v1334_v0, %v655_v2  ;;  %v955_v40 = vpop.f32.mrf.mxu1 }
 0x1d1   :  { %v849_v27 = vpop.f32.mrf.mxu3 }
 0x1d2   :  { %v757_v24 = vadd.f32 %v756_v1, %v656_v15 }
 0x1d4   :  { %v811_v45 = vadd.f32 %v810_v31, %v757_v24 }
 0x1d6   :  { %v850_v54 = vadd.f32 %v849_v27, %v811_v45 }
 0x1d7   :  { %v918_v63 = vpop.f32.mrf.mxu0 }
 0x1d8   :  { %v919_v23 = vadd.f32 %v918_v63, %v850_v54 }
 0x1da   :  { %v956_v4 = vadd.f32 %v955_v40, %v919_v23 }
 0x1dc   :  { %v958_v11 = vmax.f32 %v956_v4, 0.0 }
 0x1de   :  { %v1011_v12 = vand.u32 4294901760, %v958_v11 }
 0x1e0   :  { %v1012_v21 = vsub.f32 %v958_v11, %v1011_v12  ;;  %1117 = vmatmul.f32.vlgmr.msrb.gmra.mxu3 %v1011_v12 }
 0x1e2   :  { %1171 = vmatmul.f32.vlgmr.msra.gmra.mxu0 %v1012_v21  ;;  %v1013_v25 = vand.u32 4294901760, %v1012_v21 }
 0x1e4   :  { %1210 = vmatmul.f32.vlgmr.msra.gmra.mxu1 %v1013_v25  ;;  %v1014_v52 = vsub.f32 %v1012_v21, %v1013_v25 }
 0x1e6   :  { %v1015_v53 = vand.u32 4294901760, %v1014_v52 }
 0x1e8   :  { %1016 = vmatmul.f32.vlgmr.msrb.gmra.mxu2 %v1015_v53  ;;  %1316 = vmatmul.f32.vlgmr.msra.gmra.mxu3 %v1011_v12 }
 0x1f0   :  { %1279 = vmatmul.f32.vlgmr.msra.gmra.mxu2 %v1011_v12 }
 0x25f   :  { %v1172_v44 = vpop.f32.mrf.mxu0 }
 0x261   :  { %v1211_v48 = vpop.f32.mrf.mxu1 }
 0x263   :  { %v1118_v18 = vpop.f32.mrf.mxu3 }
 0x26b   :  { %v1017_v33 = vpop.f32.mrf.mxu2  ;;  %v1317_v5 = vpop.f32.mrf.mxu3 }
 0x26c   :  { %v1018_v34 = vadd.f32 %v1335_v58, %v1017_v33 }
 0x26e   :  { %v1119_v59 = vadd.f32 %v1118_v18, %v1018_v34 }
 0x270   :  { %v1173_v47 = vadd.f32 %v1172_v44, %v1119_v59 }
 0x272   :  { %v1212_v28 = vadd.f32 %v1211_v48, %v1173_v47 }
 0x273   :  { %v1280_v29 = vpop.f32.mrf.mxu2 }
 0x274   :  { %v1281_v61 = vadd.f32 %v1280_v29, %v1212_v28 }
 0x276   :  { %v1318_v6 = vadd.f32 %v1317_v5, %v1281_v61 }
 0x278   :  { %1321 = vst.msk [vmem:[%s2254_s9] sm:$0xff] %vm1320_vm1, %v1318_v6 }
 0x279   :  { %1326 = vsyncpa [#allocation3], 1 }
 0x27a   :  { %1327 = vsyncpa [#allocation5], 1 }

</bundles_post_ra>
